<compile_context>
chip_gen: v7x
topology: tpu7x:2x2x1
jax: 0.10.0
libtpu: 0.0.40
codegen_flags: <defaults>
</compile_context>

<pallas_src>
import functools

import jax
import jax.numpy as jnp
import numpy as np
from jax.experimental import pallas as pl
from jax.experimental.pallas import tpu as pltpu

MIN_NORM = 1e-15
BALL_EPS = 1e-5


# ----------------------------- shared math helpers -----------------------------
def _safe_norm(v):
    return jnp.maximum(jnp.sqrt(jnp.sum(v * v, axis=-1, keepdims=True)), MIN_NORM)


def _artanh(x):
    x = jnp.clip(x, -1.0 + 1e-7, 1.0 - 1e-7)
    return 0.5 * jnp.log((1.0 + x) / (1.0 - x))


def _asinh(x):
    return jnp.log(x + jnp.sqrt(x * x + 1.0))


# --------------------------------- Pallas kernel --------------------------------
def hyp_disc_kernel(f1_ref, f2_ref, wt_ref, bz_ref, scal_ref, out_ref, *, d, dp):
    c = scal_ref[0]          # curvature magnitude
    sqrt_c = scal_ref[1]     # sqrt(c)
    c_by2 = scal_ref[2]      # c * ||proj(expmap0(b))||^2        (hoisted)
    cosh_d = scal_ref[3]     # cosh(2*sqrt(c)*r)                 (hoisted)
    sinh_d = scal_ref[4]     # sinh(2*sqrt(c)*r)                 (hoisted)
    out_scale = scal_ref[5]  # 2*zg/sqrt(c)                      (hoisted)
    max_rc = 1.0 - BALL_EPS  # sqrt(c) * max projection norm (curvature-independent)

    f1 = f1_ref[...]                        # (tb, D) f32
    f2 = f2_ref[...]                        # (tb, D) f32
    hb = bz_ref[0:1, :]                     # (1, Dp) precomputed proj(expmap0(b))
    zu = bz_ref[1:2, :]                     # (1, Dp) unit MLR direction

    # ---- logmap0 per half: only the norms are needed; the per-half scale is ----
    # ---- folded through the matmul (row scaling commutes with x @ W^T). --------
    n1 = jnp.maximum(jnp.sqrt(jnp.sum(f1 * f1, axis=-1, keepdims=True)), MIN_NORM)
    n2 = jnp.maximum(jnp.sqrt(jnp.sum(f2 * f2, axis=-1, keepdims=True)), MIN_NORM)
    a1 = _artanh(sqrt_c * n1)
    a2 = _artanh(sqrt_c * n2)
    # sqrt(c)*||u|| is analytic (disjoint coordinate halves): sqrt(a1^2 + a2^2).
    rc_nu = jnp.maximum(jnp.sqrt(a1 * a1 + a2 * a2), MIN_NORM)
    t_u = jnp.minimum(jnp.tanh(rc_nu), max_rc)       # = sqrt(c) * ||proj(expmap0(u))||
    s_exp = t_u / rc_nu
    s1 = (a1 / (sqrt_c * n1)) * s_exp                # x1 = s1 * f1 (never formed)
    s2 = (a2 / (sqrt_c * n2)) * s_exp                # x2 = s2 * f2 (never formed)
    rc_xn = jnp.maximum(t_u, sqrt_c * MIN_NORM)      # sqrt(c) * safe_norm(x)

    # ---- mobius matvec on the MXU (bf16 operands, f32 accumulate). -------------
    # The weight carries an extra 128-lane block whose first column is
    # q = W^T . hyp_bias, so <mx, hyp_bias> falls out of the same dot.
    me1 = jnp.dot(f1.astype(jnp.bfloat16), wt_ref[:d, :],
                  preferred_element_type=jnp.float32)          # (tb, Dp+128)
    me2 = jnp.dot(f2.astype(jnp.bfloat16), wt_ref[d:, :],
                  preferred_element_type=jnp.float32)          # (tb, Dp+128)
    me = s1 * me1 + s2 * me2
    mx = me[:, :dp]                                            # (tb, Dp)
    xyr = jnp.sum(me[:, dp:], axis=-1, keepdims=True)          # = <mx, hyp_bias>

    mx_sq = jnp.sum(mx * mx, axis=-1, keepdims=True)
    mx_n = jnp.maximum(jnp.sqrt(mx_sq), MIN_NORM)
    tanh_t = jnp.tanh((sqrt_c * mx_n) * (_artanh(rc_xn) / rc_xn))
    # zero-row test uses the unclamped ||mx||^2.
    rc_res_n = jnp.where(mx_sq == 0.0, 0.0, jnp.minimum(tanh_t, max_rc))
    s_res = rc_res_n / (sqrt_c * mx_n)               # res = s_res * mx (never formed)

    # ---- mobius_add(res, hyp_bias): only the numerator is materialized; -------
    # ---- 1/den is carried as a column factor through every later step. --------
    xy = s_res * xyr
    cx2 = rc_res_n * rc_res_n                        # c * ||res||^2 (analytic)
    two_cxy = 2.0 * c * xy
    a_col = (1.0 + two_cxy + c_by2) * s_res
    b_col = 1.0 - cx2
    inv_den = 1.0 / jnp.maximum(1.0 + two_cxy + cx2 * c_by2, MIN_NORM)
    num = a_col * mx + b_col * hb                    # = den * h   (tb, Dp)

    # ---- v = relu(logmap0(proj(h))) = gamma * relu(num), gamma >= 0 -------------
    num_sq = jnp.sum(num * num, axis=-1, keepdims=True)
    rc_hn = jnp.maximum(sqrt_c * jnp.sqrt(num_sq) * inv_den, sqrt_c * MIN_NORM)
    gamma = inv_den * (_artanh(jnp.minimum(rc_hn, max_rc)) / rc_hn)
    p = jnp.maximum(num, 0.0)                        # v = gamma * p (never formed)
    p_sq = jnp.sum(p * p, axis=-1, keepdims=True)

    # ---- final = proj(expmap0(v)): norm analytic, folded into one column scale --
    rc_vn = jnp.maximum(sqrt_c * gamma * jnp.sqrt(p_sq), sqrt_c * MIN_NORM)
    t_v = jnp.minimum(jnp.tanh(rc_vn), max_rc)       # = sqrt(c) * ||final||
    s_fin = gamma * (t_v / rc_vn)                    # final = s_fin * p (never formed)

    # ---- Unidirectional Poincare MLR (num_outcome = 1), constants hoisted -------
    cfx2 = t_v * t_v                                 # c * ||final||^2 (analytic)
    zdot = s_fin * jnp.sum(p * zu, axis=-1, keepdims=True)
    num_m = 2.0 * sqrt_c * zdot * cosh_d - (1.0 + cfx2) * sinh_d
    den_m = jnp.maximum(1.0 - cfx2, MIN_NORM)        # can be ~1e-5 -> exact divide
    out_ref[...] = out_scale * _asinh(num_m / den_m)


# ----------------------------------- wrapper -------------------------------------
def _default_batch_tile(B):
    # largest multiple-of-8 tile <= 256 that divides B; fall back to the full batch.
    tb = 0
    for cand in range(min(256, (B // 8) * 8), 0, -8):
        if B % cand == 0:
            tb = cand
            break
    if tb == 0:
        return B
    # keep >= ~6 grid steps so each v7x TensorCore gets >= 3 iterations
    # (megacore "parallel" sharding) and tile DMAs stay hidden behind compute.
    while tb >= 16 and tb % 16 == 0 and B % (tb // 2) == 0 and B // tb < 6:
        tb //= 2
    return tb


@functools.partial(jax.jit, static_argnames=("tb",))
def hyp_discriminator(feat1, feat2, params, *, tb=None):
    B, D = feat1.shape
    Dh = params["w"].shape[0]          # layer_dims[-1]
    assert params["w"].shape == (Dh, 2 * D)
    Dp = ((Dh + 127) // 128) * 128     # hidden dim zero-padded to a lane multiple

    tb_eff = _default_batch_tile(B) if tb is None else min(tb, B)
    assert B % tb_eff == 0, "batch must be divisible by the batch tile"
    assert tb_eff == B or tb_eff % 8 == 0, "batch tile must be a multiple of 8"

    c = params["c"].astype(jnp.float32)
    sqrt_c = jnp.sqrt(c)
    maxn = (1.0 - BALL_EPS) / sqrt_c

    # ---- hoisted constant parameter transforms (computed once, outside kernel) --
    b = params["b"].reshape(1, Dh).astype(jnp.float32)
    bn = _safe_norm(b)
    hb = jnp.tanh(sqrt_c * bn) * b / (sqrt_c * bn)                 # expmap0(b)
    hbn = _safe_norm(hb)
    hyp_bias = jnp.where(hbn > maxn, hb / hbn * maxn, hb)          # proj(expmap0(b))
    bias_sq = jnp.sum(hyp_bias * hyp_bias)

    wv = params["mlr_weight_v"].astype(jnp.float32)                # (Dh, 1)
    zn = jnp.maximum(jnp.linalg.norm(wv, axis=0), MIN_NORM)
    zu = (wv / zn).T                                               # (1, Dh) unit dir

    pad = Dp - Dh
    bz = jnp.concatenate([jnp.pad(hyp_bias, ((0, 0), (0, pad))),
                          jnp.pad(zu, ((0, 0), (0, pad)))],
                         axis=0).astype(jnp.float32)               # (2, Dp)

    # weight: W^T zero-padded to Dp columns, plus a 128-lane block whose first
    # column is q = W^T . hyp_bias (so <mx, hyp_bias> is computed on the MXU).
    wt = params["w"].T.astype(jnp.float32)                         # (2D, Dh)
    q = wt @ hyp_bias.T                                            # (2D, 1)
    wt_ext = jnp.concatenate([jnp.pad(wt, ((0, 0), (0, pad))),
                              jnp.pad(q, ((0, 0), (0, 127)))],
                             axis=1).astype(jnp.bfloat16)          # (2D, Dp+128)

    drcr = 2.0 * sqrt_c * params["mlr_bias"].astype(jnp.float32)
    scal = jnp.stack([
        c,
        sqrt_c,
        c * bias_sq,
        jnp.cosh(drcr),
        jnp.sinh(drcr),
        2.0 * params["mlr_weight_g"].astype(jnp.float32) / sqrt_c,
    ]).astype(jnp.float32)

    grid = (B // tb_eff,)
    kernel = functools.partial(hyp_disc_kernel, d=D, dp=Dp)
    return pl.pallas_call(
        kernel,
        out_shape=jax.ShapeDtypeStruct((B, 1), jnp.float32),
        grid_spec=pltpu.PrefetchScalarGridSpec(
            num_scalar_prefetch=0,
            grid=grid,
            in_specs=[
                pl.BlockSpec((tb_eff, D), lambda i: (i, 0)),        # feat1 tile
                pl.BlockSpec((tb_eff, D), lambda i: (i, 0)),        # feat2 tile
                pl.BlockSpec((2 * D, Dp + 128), lambda i: (0, 0)),  # [W^T | q] (resident)
                pl.BlockSpec((2, Dp), lambda i: (0, 0)),            # [hyp_bias; z_unit]
                pl.BlockSpec(memory_space=pltpu.MemorySpace.SMEM),  # hoisted scalars
            ],
            out_specs=pl.BlockSpec((tb_eff, 1), lambda i: (i, 0)),
        ),
        compiler_params=pltpu.CompilerParams(
            dimension_semantics=("parallel",),
            # fits the v7x (64 MiB physical / 32 MiB scoped default) budget too.
            vmem_limit_bytes=32 * 1024 * 1024),
    )(feat1.astype(jnp.float32), feat2.astype(jnp.float32), wt_ext, bz, scal)


# ------------------------------- pure-JAX reference -------------------------------
def ref_forward(feat1, feat2, params):
    c = params["c"]
    sqrt_c = jnp.sqrt(c)

    def logmap0(y):
        n = _safe_norm(y)
        return _artanh(sqrt_c * n) * y / (sqrt_c * n)

    def expmap0(u):
        n = _safe_norm(u)
        return jnp.tanh(sqrt_c * n) * u / (sqrt_c * n)

    def proj(x):
        n = _safe_norm(x)
        maxn = (1.0 - BALL_EPS) / sqrt_c
        return jnp.where(n > maxn, x / n * maxn, x)

    def mobius_add(x, y):
        x2 = jnp.sum(x * x, -1, keepdims=True)
        y2 = jnp.sum(y * y, -1, keepdims=True)
        xy = jnp.sum(x * y, -1, keepdims=True)
        num = (1.0 + 2.0 * c * xy + c * y2) * x + (1.0 - c * x2) * y
        den = 1.0 + 2.0 * c * xy + c * c * x2 * y2
        return num / jnp.maximum(den, MIN_NORM)

    u = jnp.concatenate([logmap0(feat1), logmap0(feat2)], axis=-1)
    x = proj(expmap0(u))
    mx = x @ params["w"].T
    x_n, mx_n = _safe_norm(x), _safe_norm(mx)
    res = jnp.tanh(mx_n / x_n * _artanh(sqrt_c * x_n)) * mx / (mx_n * sqrt_c)
    res = jnp.where(jnp.sum(jnp.abs(mx), -1, keepdims=True) == 0.0, 0.0, res)
    res = proj(res)
    res = proj(mobius_add(res, proj(expmap0(params["b"].reshape(1, -1)))))
    res = proj(expmap0(jnp.maximum(logmap0(res), 0.0)))

    wv = params["mlr_weight_v"]
    zu = (wv / jnp.maximum(jnp.linalg.norm(wv, axis=0), 1e-15)).T
    drcr = 2.0 * sqrt_c * params["mlr_bias"]
    rcx = sqrt_c * res
    cx2 = jnp.sum(rcx * rcx, -1, keepdims=True)
    dot = jnp.sum(rcx * zu, -1, keepdims=True)
    num = 2.0 * dot * jnp.cosh(drcr) - (1.0 + cx2) * jnp.sinh(drcr)
    den = jnp.maximum(1.0 - cx2, 1e-15)
    return 2.0 * params["mlr_weight_g"] / sqrt_c * _asinh(num / den)


# ------------------------------------- main ---------------------------------------
if __name__ == "__main__":
    B, D, Dh = 32, 64, 64          # batch, per-feature dim, layer_dims[-1]
    key = jax.random.PRNGKey(0)
    k1, k2, k3, k4, k5, k6 = jax.random.split(key, 6)

    # inputs: points inside the Poincare ball (norm < 1)
    f1 = jax.random.normal(k1, (B, D), jnp.float32)
    f2 = jax.random.normal(k2, (B, D), jnp.float32)
    f1 = 0.4 * f1 / (1.0 + jnp.linalg.norm(f1, axis=-1, keepdims=True))
    f2 = 0.4 * f2 / (1.0 + jnp.linalg.norm(f2, axis=-1, keepdims=True))

    # deterministic synthetic parameters
    wv = jax.random.normal(k5, (Dh, 1), jnp.float32) * (2.0 * Dh) ** -0.5
    params = {
        "c": jnp.float32(1.0),                                        # curvature
        "w": jax.random.normal(k3, (Dh, 2 * D), jnp.float32) * 0.05,  # HypLinear weight
        "b": jax.random.normal(k4, (Dh,), jnp.float32) * 0.05,        # HypLinear bias
        "mlr_weight_v": wv,
        "mlr_weight_g": jnp.linalg.norm(wv),
        "mlr_bias": jax.random.normal(k6, (), jnp.float32) * 0.01,
    }

    # default tile heuristic picks tb=8 here -> 4 grid steps (exercises the
    # pipeline and v7x megacore sharding); production batches get tb up to 256.
    out = jax.block_until_ready(hyp_discriminator(f1, f2, params))
    ref = jax.block_until_ready(ref_forward(f1, f2, params))

    assert out.shape == (B, 1), out.shape
    # delta vs. the f32 reference is dominated by the bf16 MXU operands.
    np.testing.assert_allclose(np.asarray(out), np.asarray(ref), rtol=1e-2, atol=4e-3)
    print("KERNEL_OK")
</pallas_src>

<mosaic_0001>
module attributes {stable_mosaic.version = 11 : i64} {
  func.func @hyp_disc_kernel(%arg0: i32, %arg1: memref<8x64xf32, #tpu.memory_space<vmem>>, %arg2: memref<8x64xf32, #tpu.memory_space<vmem>>, %arg3: memref<128x256xbf16, #tpu.memory_space<vmem>>, %arg4: memref<2x128xf32, #tpu.memory_space<vmem>>, %arg5: memref<6xf32, #tpu.memory_space<smem>>, %arg6: memref<8x1xf32, #tpu.memory_space<vmem>>) attributes {dimension_semantics = [#tpu.dimension_semantics<parallel>], iteration_bounds = array<i64: 4>, scalar_prefetch = 0 : i64, scratch_operands = 0 : i64, tpu.core_type = #tpu.core_type<tc>, window_params = [{transform_indices = @transform_0, window_bounds = array<i64: 8, 64>}, {transform_indices = @transform_1, window_bounds = array<i64: 8, 64>}, {pipeline_mode = #tpu.pipeline_mode<synchronous>, transform_indices = @transform_2, window_bounds = array<i64: 128, 256>}, {pipeline_mode = #tpu.pipeline_mode<synchronous>, transform_indices = @transform_3, window_bounds = array<i64: 2, 128>}, {transform_indices = @transform_4, window_bounds = array<i64: 6>}, {transform_indices = @transform_5, window_bounds = array<i64: 8, 1>}]} {
    %c0 = arith.constant 0 : index
    %0 = memref.load %arg5[%c0] : memref<6xf32, #tpu.memory_space<smem>>
    %c1 = arith.constant 1 : index
    %1 = memref.load %arg5[%c1] : memref<6xf32, #tpu.memory_space<smem>>
    %c2 = arith.constant 2 : index
    %2 = memref.load %arg5[%c2] : memref<6xf32, #tpu.memory_space<smem>>
    %c3 = arith.constant 3 : index
    %3 = memref.load %arg5[%c3] : memref<6xf32, #tpu.memory_space<smem>>
    %c4 = arith.constant 4 : index
    %4 = memref.load %arg5[%c4] : memref<6xf32, #tpu.memory_space<smem>>
    %c5 = arith.constant 5 : index
    %5 = memref.load %arg5[%c5] : memref<6xf32, #tpu.memory_space<smem>>
    %c0_0 = arith.constant 0 : index
    %c0_1 = arith.constant 0 : index
    %6 = vector.load %arg1[%c0_0, %c0_1] : memref<8x64xf32, #tpu.memory_space<vmem>>, vector<8x64xf32>
    %c0_2 = arith.constant 0 : index
    %c0_3 = arith.constant 0 : index
    %7 = vector.load %arg2[%c0_2, %c0_3] : memref<8x64xf32, #tpu.memory_space<vmem>>, vector<8x64xf32>
    %c0_4 = arith.constant 0 : index
    %c0_5 = arith.constant 0 : index
    %8 = vector.load %arg4[%c0_4, %c0_5] : memref<2x128xf32, #tpu.memory_space<vmem>>, vector<1x128xf32>
    %c1_6 = arith.constant 1 : index
    %c0_7 = arith.constant 0 : index
    %9 = vector.load %arg4[%c1_6, %c0_7] : memref<2x128xf32, #tpu.memory_space<vmem>>, vector<1x128xf32>
    %10 = arith.mulf %6, %6 : vector<8x64xf32>
    %cst = arith.constant dense<0.000000e+00> : vector<8xf32>
    %11 = vector.multi_reduction <add>, %10, %cst [1] : vector<8x64xf32> to vector<8xf32>
    %12 = vector.shape_cast %11 : vector<8xf32> to vector<8x1xf32>
    %13 = math.sqrt %12 : vector<8x1xf32>
    %cst_8 = arith.constant 1.000000e-15 : f32
    %14 = vector.broadcast %cst_8 : f32 to vector<8x1xf32>
    %15 = arith.maximumf %13, %14 : vector<8x1xf32>
    %16 = arith.mulf %7, %7 : vector<8x64xf32>
    %cst_9 = arith.constant dense<0.000000e+00> : vector<8xf32>
    %17 = vector.multi_reduction <add>, %16, %cst_9 [1] : vector<8x64xf32> to vector<8xf32>
    %18 = vector.shape_cast %17 : vector<8xf32> to vector<8x1xf32>
    %19 = math.sqrt %18 : vector<8x1xf32>
    %cst_10 = arith.constant 1.000000e-15 : f32
    %20 = vector.broadcast %cst_10 : f32 to vector<8x1xf32>
    %21 = arith.maximumf %19, %20 : vector<8x1xf32>
    %22 = vector.broadcast %1 : f32 to vector<8x1xf32>
    %23 = arith.mulf %22, %15 : vector<8x1xf32>
    %cst_11 = arith.constant -0.99999988 : f32
    %cst_12 = arith.constant 0.99999988 : f32
    %24 = vector.broadcast %cst_11 : f32 to vector<8x1xf32>
    %25 = arith.maximumf %24, %23 : vector<8x1xf32>
    %26 = vector.broadcast %cst_12 : f32 to vector<8x1xf32>
    %27 = arith.minimumf %26, %25 : vector<8x1xf32>
    %cst_13 = arith.constant 1.000000e+00 : f32
    %28 = vector.broadcast %cst_13 : f32 to vector<8x1xf32>
    %29 = arith.addf %28, %27 : vector<8x1xf32>
    %cst_14 = arith.constant 1.000000e+00 : f32
    %30 = vector.broadcast %cst_14 : f32 to vector<8x1xf32>
    %31 = arith.subf %30, %27 : vector<8x1xf32>
    %32 = arith.divf %29, %31 : vector<8x1xf32>
    %33 = math.log %32 : vector<8x1xf32>
    %cst_15 = arith.constant 5.000000e-01 : f32
    %34 = vector.broadcast %cst_15 : f32 to vector<8x1xf32>
    %35 = arith.mulf %34, %33 : vector<8x1xf32>
    %36 = vector.broadcast %1 : f32 to vector<8x1xf32>
    %37 = arith.mulf %36, %21 : vector<8x1xf32>
    %cst_16 = arith.constant -0.99999988 : f32
    %cst_17 = arith.constant 0.99999988 : f32
    %38 = vector.broadcast %cst_16 : f32 to vector<8x1xf32>
    %39 = arith.maximumf %38, %37 : vector<8x1xf32>
    %40 = vector.broadcast %cst_17 : f32 to vector<8x1xf32>
    %41 = arith.minimumf %40, %39 : vector<8x1xf32>
    %cst_18 = arith.constant 1.000000e+00 : f32
    %42 = vector.broadcast %cst_18 : f32 to vector<8x1xf32>
    %43 = arith.addf %42, %41 : vector<8x1xf32>
    %cst_19 = arith.constant 1.000000e+00 : f32
    %44 = vector.broadcast %cst_19 : f32 to vector<8x1xf32>
    %45 = arith.subf %44, %41 : vector<8x1xf32>
    %46 = arith.divf %43, %45 : vector<8x1xf32>
    %47 = math.log %46 : vector<8x1xf32>
    %cst_20 = arith.constant 5.000000e-01 : f32
    %48 = vector.broadcast %cst_20 : f32 to vector<8x1xf32>
    %49 = arith.mulf %48, %47 : vector<8x1xf32>
    %50 = arith.mulf %35, %35 : vector<8x1xf32>
    %51 = arith.mulf %49, %49 : vector<8x1xf32>
    %52 = arith.addf %50, %51 : vector<8x1xf32>
    %53 = math.sqrt %52 : vector<8x1xf32>
    %cst_21 = arith.constant 1.000000e-15 : f32
    %54 = vector.broadcast %cst_21 : f32 to vector<8x1xf32>
    %55 = arith.maximumf %53, %54 : vector<8x1xf32>
    %56 = math.tanh %55 : vector<8x1xf32>
    %cst_22 = arith.constant 0.999989986 : f32
    %57 = vector.broadcast %cst_22 : f32 to vector<8x1xf32>
    %58 = arith.minimumf %56, %57 : vector<8x1xf32>
    %59 = arith.divf %58, %55 : vector<8x1xf32>
    %60 = vector.broadcast %1 : f32 to vector<8x1xf32>
    %61 = arith.mulf %60, %15 : vector<8x1xf32>
    %62 = arith.divf %35, %61 : vector<8x1xf32>
    %63 = arith.mulf %62, %59 : vector<8x1xf32>
    %64 = vector.broadcast %1 : f32 to vector<8x1xf32>
    %65 = arith.mulf %64, %21 : vector<8x1xf32>
    %66 = arith.divf %49, %65 : vector<8x1xf32>
    %67 = arith.mulf %66, %59 : vector<8x1xf32>
    %cst_23 = arith.constant 1.000000e-15 : f32
    %68 = arith.mulf %1, %cst_23 : f32
    %69 = vector.broadcast %68 : f32 to vector<8x1xf32>
    %70 = arith.maximumf %58, %69 : vector<8x1xf32>
    %71 = arith.truncf %6 : vector<8x64xf32> to vector<8x64xbf16>
    %c0_24 = arith.constant 0 : index
    %c0_25 = arith.constant 0 : index
    %72 = vector.load %arg3[%c0_24, %c0_25] : memref<128x256xbf16, #tpu.memory_space<vmem>>, vector<64x256xbf16>
    %cst_26 = arith.constant dense<0.000000e+00> : vector<8x256xf32>
    %73 = tpu.matmul %71, %72, %cst_26 {dimension_numbers = #tpu.dot_dimension_numbers<[1], [0], [0], [1], [0, 0, 1, 1], [], []>} : vector<8x64xbf16>, vector<64x256xbf16>, vector<8x256xf32> -> vector<8x256xf32>
    %74 = arith.truncf %7 : vector<8x64xf32> to vector<8x64xbf16>
    %c64 = arith.constant 64 : index
    %c0_27 = arith.constant 0 : index
    %75 = vector.load %arg3[%c64, %c0_27] : memref<128x256xbf16, #tpu.memory_space<vmem>>, vector<64x256xbf16>
    %cst_28 = arith.constant dense<0.000000e+00> : vector<8x256xf32>
    %76 = tpu.matmul %74, %75, %cst_28 {dimension_numbers = #tpu.dot_dimension_numbers<[1], [0], [0], [1], [0, 0, 1, 1], [], []>} : vector<8x64xbf16>, vector<64x256xbf16>, vector<8x256xf32> -> vector<8x256xf32>
    %77 = vector.broadcast %63 : vector<8x1xf32> to vector<8x256xf32>
    %78 = arith.mulf %77, %73 : vector<8x256xf32>
    %79 = vector.broadcast %67 : vector<8x1xf32> to vector<8x256xf32>
    %80 = arith.mulf %79, %76 : vector<8x256xf32>
    %81 = arith.addf %78, %80 : vector<8x256xf32>
    %82 = vector.extract_strided_slice %81 {offsets = [0, 0], sizes = [8, 128], strides = [1, 1]} : vector<8x256xf32> to vector<8x128xf32>
    %83 = vector.extract_strided_slice %81 {offsets = [0, 128], sizes = [8, 128], strides = [1, 1]} : vector<8x256xf32> to vector<8x128xf32>
    %cst_29 = arith.constant dense<0.000000e+00> : vector<8xf32>
    %84 = vector.multi_reduction <add>, %83, %cst_29 [1] : vector<8x128xf32> to vector<8xf32>
    %85 = vector.shape_cast %84 : vector<8xf32> to vector<8x1xf32>
    %86 = arith.mulf %82, %82 : vector<8x128xf32>
    %cst_30 = arith.constant dense<0.000000e+00> : vector<8xf32>
    %87 = vector.multi_reduction <add>, %86, %cst_30 [1] : vector<8x128xf32> to vector<8xf32>
    %88 = vector.shape_cast %87 : vector<8xf32> to vector<8x1xf32>
    %89 = math.sqrt %88 : vector<8x1xf32>
    %cst_31 = arith.constant 1.000000e-15 : f32
    %90 = vector.broadcast %cst_31 : f32 to vector<8x1xf32>
    %91 = arith.maximumf %89, %90 : vector<8x1xf32>
    %92 = vector.broadcast %1 : f32 to vector<8x1xf32>
    %93 = arith.mulf %92, %91 : vector<8x1xf32>
    %cst_32 = arith.constant -0.99999988 : f32
    %cst_33 = arith.constant 0.99999988 : f32
    %94 = vector.broadcast %cst_32 : f32 to vector<8x1xf32>
    %95 = arith.maximumf %94, %70 : vector<8x1xf32>
    %96 = vector.broadcast %cst_33 : f32 to vector<8x1xf32>
    %97 = arith.minimumf %96, %95 : vector<8x1xf32>
    %cst_34 = arith.constant 1.000000e+00 : f32
    %98 = vector.broadcast %cst_34 : f32 to vector<8x1xf32>
    %99 = arith.addf %98, %97 : vector<8x1xf32>
    %cst_35 = arith.constant 1.000000e+00 : f32
    %100 = vector.broadcast %cst_35 : f32 to vector<8x1xf32>
    %101 = arith.subf %100, %97 : vector<8x1xf32>
    %102 = arith.divf %99, %101 : vector<8x1xf32>
    %103 = math.log %102 : vector<8x1xf32>
    %cst_36 = arith.constant 5.000000e-01 : f32
    %104 = vector.broadcast %cst_36 : f32 to vector<8x1xf32>
    %105 = arith.mulf %104, %103 : vector<8x1xf32>
    %106 = arith.divf %105, %70 : vector<8x1xf32>
    %107 = arith.mulf %93, %106 : vector<8x1xf32>
    %108 = math.tanh %107 : vector<8x1xf32>
    %cst_37 = arith.constant 0.000000e+00 : f32
    %109 = vector.broadcast %cst_37 : f32 to vector<8x1xf32>
    %110 = arith.cmpf oeq, %88, %109 : vector<8x1xf32>
    %cst_38 = arith.constant 0.999989986 : f32
    %111 = vector.broadcast %cst_38 : f32 to vector<8x1xf32>
    %112 = arith.minimumf %108, %111 : vector<8x1xf32>
    %cst_39 = arith.constant 0.000000e+00 : f32
    %113 = vector.broadcast %cst_39 : f32 to vector<8x1xf32>
    %114 = arith.select %110, %113, %112 : vector<8x1xi1>, vector<8x1xf32>
    %115 = vector.broadcast %1 : f32 to vector<8x1xf32>
    %116 = arith.mulf %115, %91 : vector<8x1xf32>
    %117 = arith.divf %114, %116 : vector<8x1xf32>
    %118 = arith.mulf %117, %85 : vector<8x1xf32>
    %119 = arith.mulf %114, %114 : vector<8x1xf32>
    %cst_40 = arith.constant 2.000000e+00 : f32
    %120 = arith.mulf %cst_40, %0 : f32
    %121 = vector.broadcast %120 : f32 to vector<8x1xf32>
    %122 = arith.mulf %121, %118 : vector<8x1xf32>
    %cst_41 = arith.constant 1.000000e+00 : f32
    %123 = vector.broadcast %cst_41 : f32 to vector<8x1xf32>
    %124 = arith.addf %123, %122 : vector<8x1xf32>
    %125 = vector.broadcast %2 : f32 to vector<8x1xf32>
    %126 = arith.addf %124, %125 : vector<8x1xf32>
    %127 = arith.mulf %126, %117 : vector<8x1xf32>
    %cst_42 = arith.constant 1.000000e+00 : f32
    %128 = vector.broadcast %cst_42 : f32 to vector<8x1xf32>
    %129 = arith.subf %128, %119 : vector<8x1xf32>
    %cst_43 = arith.constant 1.000000e+00 : f32
    %130 = vector.broadcast %cst_43 : f32 to vector<8x1xf32>
    %131 = arith.addf %130, %122 : vector<8x1xf32>
    %132 = vector.broadcast %2 : f32 to vector<8x1xf32>
    %133 = arith.mulf %119, %132 : vector<8x1xf32>
    %134 = arith.addf %131, %133 : vector<8x1xf32>
    %cst_44 = arith.constant 1.000000e-15 : f32
    %135 = vector.broadcast %cst_44 : f32 to vector<8x1xf32>
    %136 = arith.maximumf %134, %135 : vector<8x1xf32>
    %cst_45 = arith.constant 1.000000e+00 : f32
    %137 = vector.broadcast %cst_45 : f32 to vector<8x1xf32>
    %138 = arith.divf %137, %136 : vector<8x1xf32>
    %139 = vector.broadcast %127 : vector<8x1xf32> to vector<8x128xf32>
    %140 = arith.mulf %139, %82 : vector<8x128xf32>
    %141 = vector.broadcast %129 : vector<8x1xf32> to vector<8x128xf32>
    %142 = vector.broadcast %8 : vector<1x128xf32> to vector<8x128xf32>
    %143 = arith.mulf %141, %142 : vector<8x128xf32>
    %144 = arith.addf %140, %143 : vector<8x128xf32>
    %145 = arith.mulf %144, %144 : vector<8x128xf32>
    %cst_46 = arith.constant dense<0.000000e+00> : vector<8xf32>
    %146 = vector.multi_reduction <add>, %145, %cst_46 [1] : vector<8x128xf32> to vector<8xf32>
    %147 = vector.shape_cast %146 : vector<8xf32> to vector<8x1xf32>
    %148 = math.sqrt %147 : vector<8x1xf32>
    %149 = vector.broadcast %1 : f32 to vector<8x1xf32>
    %150 = arith.mulf %149, %148 : vector<8x1xf32>
    %151 = arith.mulf %150, %138 : vector<8x1xf32>
    %cst_47 = arith.constant 1.000000e-15 : f32
    %152 = arith.mulf %1, %cst_47 : f32
    %153 = vector.broadcast %152 : f32 to vector<8x1xf32>
    %154 = arith.maximumf %151, %153 : vector<8x1xf32>
    %cst_48 = arith.constant 0.999989986 : f32
    %155 = vector.broadcast %cst_48 : f32 to vector<8x1xf32>
    %156 = arith.minimumf %154, %155 : vector<8x1xf32>
    %cst_49 = arith.constant -0.99999988 : f32
    %cst_50 = arith.constant 0.99999988 : f32
    %157 = vector.broadcast %cst_49 : f32 to vector<8x1xf32>
    %158 = arith.maximumf %157, %156 : vector<8x1xf32>
    %159 = vector.broadcast %cst_50 : f32 to vector<8x1xf32>
    %160 = arith.minimumf %159, %158 : vector<8x1xf32>
    %cst_51 = arith.constant 1.000000e+00 : f32
    %161 = vector.broadcast %cst_51 : f32 to vector<8x1xf32>
    %162 = arith.addf %161, %160 : vector<8x1xf32>
    %cst_52 = arith.constant 1.000000e+00 : f32
    %163 = vector.broadcast %cst_52 : f32 to vector<8x1xf32>
    %164 = arith.subf %163, %160 : vector<8x1xf32>
    %165 = arith.divf %162, %164 : vector<8x1xf32>
    %166 = math.log %165 : vector<8x1xf32>
    %cst_53 = arith.constant 5.000000e-01 : f32
    %167 = vector.broadcast %cst_53 : f32 to vector<8x1xf32>
    %168 = arith.mulf %167, %166 : vector<8x1xf32>
    %169 = arith.divf %168, %154 : vector<8x1xf32>
    %170 = arith.mulf %138, %169 : vector<8x1xf32>
    %cst_54 = arith.constant 0.000000e+00 : f32
    %171 = vector.broadcast %cst_54 : f32 to vector<8x128xf32>
    %172 = arith.maximumf %144, %171 : vector<8x128xf32>
    %173 = arith.mulf %172, %172 : vector<8x128xf32>
    %cst_55 = arith.constant dense<0.000000e+00> : vector<8xf32>
    %174 = vector.multi_reduction <add>, %173, %cst_55 [1] : vector<8x128xf32> to vector<8xf32>
    %175 = vector.shape_cast %174 : vector<8xf32> to vector<8x1xf32>
    %176 = vector.broadcast %1 : f32 to vector<8x1xf32>
    %177 = arith.mulf %176, %170 : vector<8x1xf32>
    %178 = math.sqrt %175 : vector<8x1xf32>
    %179 = arith.mulf %177, %178 : vector<8x1xf32>
    %cst_56 = arith.constant 1.000000e-15 : f32
    %180 = arith.mulf %1, %cst_56 : f32
    %181 = vector.broadcast %180 : f32 to vector<8x1xf32>
    %182 = arith.maximumf %179, %181 : vector<8x1xf32>
    %183 = math.tanh %182 : vector<8x1xf32>
    %cst_57 = arith.constant 0.999989986 : f32
    %184 = vector.broadcast %cst_57 : f32 to vector<8x1xf32>
    %185 = arith.minimumf %183, %184 : vector<8x1xf32>
    %186 = arith.divf %185, %182 : vector<8x1xf32>
    %187 = arith.mulf %170, %186 : vector<8x1xf32>
    %188 = arith.mulf %185, %185 : vector<8x1xf32>
    %189 = vector.broadcast %9 : vector<1x128xf32> to vector<8x128xf32>
    %190 = arith.mulf %172, %189 : vector<8x128xf32>
    %cst_58 = arith.constant dense<0.000000e+00> : vector<8xf32>
    %191 = vector.multi_reduction <add>, %190, %cst_58 [1] : vector<8x128xf32> to vector<8xf32>
    %192 = vector.shape_cast %191 : vector<8xf32> to vector<8x1xf32>
    %193 = arith.mulf %187, %192 : vector<8x1xf32>
    %cst_59 = arith.constant 2.000000e+00 : f32
    %194 = arith.mulf %cst_59, %1 : f32
    %195 = vector.broadcast %194 : f32 to vector<8x1xf32>
    %196 = arith.mulf %195, %193 : vector<8x1xf32>
    %197 = vector.broadcast %3 : f32 to vector<8x1xf32>
    %198 = arith.mulf %196, %197 : vector<8x1xf32>
    %cst_60 = arith.constant 1.000000e+00 : f32
    %199 = vector.broadcast %cst_60 : f32 to vector<8x1xf32>
    %200 = arith.addf %199, %188 : vector<8x1xf32>
    %201 = vector.broadcast %4 : f32 to vector<8x1xf32>
    %202 = arith.mulf %200, %201 : vector<8x1xf32>
    %203 = arith.subf %198, %202 : vector<8x1xf32>
    %cst_61 = arith.constant 1.000000e+00 : f32
    %204 = vector.broadcast %cst_61 : f32 to vector<8x1xf32>
    %205 = arith.subf %204, %188 : vector<8x1xf32>
    %cst_62 = arith.constant 1.000000e-15 : f32
    %206 = vector.broadcast %cst_62 : f32 to vector<8x1xf32>
    %207 = arith.maximumf %205, %206 : vector<8x1xf32>
    %208 = arith.divf %203, %207 : vector<8x1xf32>
    %209 = arith.mulf %208, %208 : vector<8x1xf32>
    %cst_63 = arith.constant 1.000000e+00 : f32
    %210 = vector.broadcast %cst_63 : f32 to vector<8x1xf32>
    %211 = arith.addf %209, %210 : vector<8x1xf32>
    %212 = math.sqrt %211 : vector<8x1xf32>
    %213 = arith.addf %208, %212 : vector<8x1xf32>
    %214 = math.log %213 : vector<8x1xf32>
    %215 = vector.broadcast %5 : f32 to vector<8x1xf32>
    %216 = arith.mulf %215, %214 : vector<8x1xf32>
    %c0_64 = arith.constant 0 : index
    %c0_65 = arith.constant 0 : index
    %217 = vector.load %arg6[%c0_64, %c0_65] : memref<8x1xf32, #tpu.memory_space<vmem>>, vector<8x1xf32>
    tpu.vector_store %arg6[%c0_64, %c0_65], %216 {strides = array<i32>} : memref<8x1xf32, #tpu.memory_space<vmem>>, vector<8x1xf32>,
    return
  }
  func.func @transform_0(%arg0: i32) -> (i32, i32) {
    %c0_i32 = arith.constant 0 : i32
    %c0_i32_0 = arith.constant 0 : i32
    return %arg0, %c0_i32 : i32, i32
  }
  func.func @transform_1(%arg0: i32) -> (i32, i32) {
    %c0_i32 = arith.constant 0 : i32
    %c0_i32_0 = arith.constant 0 : i32
    return %arg0, %c0_i32 : i32, i32
  }
  func.func @transform_2(%arg0: i32) -> (i32, i32) {
    %c0_i32 = arith.constant 0 : i32
    %c0_i32_0 = arith.constant 0 : i32
    %c0_i32_1 = arith.constant 0 : i32
    return %c0_i32, %c0_i32_0 : i32, i32
  }
  func.func @transform_3(%arg0: i32) -> (i32, i32) {
    %c0_i32 = arith.constant 0 : i32
    %c0_i32_0 = arith.constant 0 : i32
    %c0_i32_1 = arith.constant 0 : i32
    return %c0_i32, %c0_i32_0 : i32, i32
  }
  func.func @transform_4(%arg0: i32) -> i32 {
    %c0_i32 = arith.constant 0 : i32
    %c0_i32_0 = arith.constant 0 : i32
    return %c0_i32 : i32
  }
  func.func @transform_5(%arg0: i32) -> (i32, i32) {
    %c0_i32 = arith.constant 0 : i32
    %c0_i32_0 = arith.constant 0 : i32
    return %arg0, %c0_i32 : i32, i32
  }
}

</mosaic_0001>

<bundles_post_ra>
// kernel: hyp_discriminator.1
= control target key start
LH: loop header
LB: loop body
LE: loop exit
PB: predicated region body
PF: predicated region fallthrough
CT: control target
= control target key end

     0   :  { %10 = vsyncpa [#allocation3], 0  ;;  %s938_s18 = smov 0   ;;  %s1054_s0 = inlined_call_operand.vmem [shape: f32[32,64], index: 0, kind: input, shape index: {}]   ;;  %s1055_s1 = inlined_call_operand.vmem [shape: f32[32,64], index: 1, kind: input, shape index: {}]   ;;  %s1056_s2 = inlined_call_operand.vmem [shape: bf16[128,256], index: 2, kind: input, shape index: {}]   ;;  %s1057_s3 = inlined_call_operand.vmem [shape: f32[2,128], index: 3, kind: input, shape index: {}]   ;;  %s1058_s4 = inlined_call_operand.vmem [shape: f32[6], index: 4, kind: input, shape index: {}]   ;;  %s1059_s5 = inlined_call_operand.vmem [shape: f32[32,1], index: 5, kind: output, shape index: {}]  }
   0x1 LB: > { %s738_s19 = sadd.s32 4294967295, %s904_s18   ;;  %p740_p0 = scmp.ge.s32.totalorder %s904_s18, 1  ;;  %s904_s18 = sphi %s938_s18, %s16_s18  }
   0x2   : > { %p162_p1 = scmp.lt.s32.totalorder %s904_s18, 5  ;;  %s181_s22 = sshll.u32 %s1058_s4, 4  ;;  %s182_s22 = int_to_ptr.vmem [resolvable:$true] %s181_s22 }
   0x3   : > { %p787_p3 = scmp.eq.s32.totalorder %s738_s19, 0  ;;  %s879_s24 = scalar_lea.vmem %s182_s22, 16 }
   0x4   : > { %p949_p2 = pnand %p740_p0, %p162_p1  ;;  %p880_p6 = scmp.ne.s32.totalorder %s182_s22, %s879_s24 }
   0x5   : > { %p887_p10 = scmp.lt.s32.totalorder %s182_s22, %s182_s22  ;;  %p888_p11 = scmp.lt.s32.totalorder %s879_s24, %s879_s24 }
   0x6   : > { %p783_p4 = pneg %p949_p2 }
   0x7   : > { %p889_p12 = por %p888_p11, %p887_p10 }
   0x8   : > { %p784_p5 = pnand %p787_p3, %p783_p4 }
   0xa   : > { %p881_p7 = pneg %p784_p5 }
   0xc   : > { %p882_p8 = pnand %p881_p7, %p880_p6 }
   0xe   : > { %p883_p9 = pneg %p882_p8 }
  0x10   : > { %p890_p13 = pnand %p889_p12, %p883_p9 }
  0x12   : > { %893 = shalt.err (!%p890_p13)
}
  0x13   : > { %s906_s25 = smov [#allocation2]   ;;  %208 = sbr.rel (%p949_p2) target bundleno = 750 (0x2ee), region = 40 }
  0x14   : > { %786 = dma.vmem_to_smem (!%p784_p5), %s182_s22, 16, %s906_s25, [#allocation3]  }
  0x1a   : > { %899 = dma.done.wait (%p787_p3), [#allocation3], 16  }
  0x1b   : > { %901 = vsyncadd (%p787_p3), [#allocation3], 4294967280 }
  0x1c   : > { %214 = sfence }
  0x1d   : > { %p239_p0 = scmp.lt.s32.totalorder %s738_s19, 3  ;;  %v799_v0 = vld [vmem:[%s1056_s2 + $0x4] ss:$8 sps:$4 sm:$0xff]   ;;  %v803_v2 = vld [vmem:[%s1056_s2] ss:$8 sps:$4 sm:$0xff]   ;;  %v907_v4 = vmov 0  }
  0x1e   : > { %v801_v1 = vld [vmem:[%s1056_s2 + $0x44] ss:$8 sps:$4 sm:$0xff]   ;;  %384 = vmatprep.subr.bf16.mxu0 %v799_v0  ;;  %v804_v3 = vld [vmem:[%s1056_s2 + $0x40] ss:$8 sps:$4 sm:$0xff]   ;;  %416 = vmatprep.mubr.bf16.mxu0 %v907_v4  ;;  %v805_v5 = vld [vmem:[%s1056_s2 + $0x14] ss:$8 sps:$4 sm:$0xff]  }
  0x1f   : > { %s1062_s19 = smov (!%p239_p0, %s738_s19), 3  ;;  %477 = vmatprep.subr.bf16.mxu1 %v801_v1  ;;  %509 = vmatprep.mubr.bf16.mxu1 %v907_v4  ;;  %v807_v6 = vld [vmem:[%s1056_s2 + $0x54] ss:$8 sps:$4 sm:$0xff]   ;;  %v809_v7 = vld [vmem:[%s1056_s2 + $0x10] ss:$8 sps:$4 sm:$0xff]   ;;  %vm263_vm0 = vcmask 523264  }
  0x20   : > { %s975_s11 = sshll.u32 %s1062_s19, 3  ;;  %385 = vmatpush1.bf16.msra.mxu0 %v803_v2  ;;  %478 = vmatpush1.bf16.msra.mxu1 %v804_v3  ;;  %v810_v8 = vld [vmem:[%s1056_s2 + $0x50] ss:$8 sps:$4 sm:$0xff]   ;;  %v811_v10 = vld [vmem:[%s1056_s2 + $0x24] ss:$8 sps:$4 sm:$0xff]   ;;  %s1022_s17 = sld [smem:[#allocation2 + $0x1]] }
  0x21   : > { %s242_s20 = scalar_lea.vmem %s1054_s0, %s975_s11  ;;  %386 = vmatprep.subr.bf16.mxu0 %v805_v5  ;;  %s246_s24 = scalar_lea.vmem %s1055_s1, %s975_s11  ;;  %479 = vmatprep.subr.bf16.mxu1 %v807_v6  ;;  %v813_v13 = vld [vmem:[%s1056_s2 + $0x64] ss:$8 sps:$4 sm:$0xff]   ;;  %v815_v15 = vld [vmem:[%s1056_s2 + $0x20] ss:$8 sps:$4 sm:$0xff]   ;;  %v817_v18 = vld [vmem:[%s1056_s2 + $0x34] ss:$8 sps:$4 sm:$0xff]  }
  0x22   : > { %v258_v9 = vld [vmem:[%s242_s20] sm:$0xff]  ;;  %v819_v19 = vld [vmem:[%s1056_s2 + $0x74] ss:$8 sps:$4 sm:$0xff]   ;;  %v821_v21 = vld [vmem:[%s1056_s2 + $0x30] ss:$8 sps:$4 sm:$0xff]   ;;  %s252_s21 = sld [smem:[#allocation2]]  ;;  %s250_s8 = scalar_lea.vmem %s1059_s5, %s975_s11 }
  0x23   : > { %v262_v11 = vmul.f32 %v258_v9, %v258_v9  ;;  %v259_v12 = vld [vmem:[%s246_s24] sm:$0xff]  ;;  %v822_v22 = vld [vmem:[%s1056_s2 + $0x70] ss:$8 sps:$4 sm:$0xff]   ;;  %v332_v23 = vpack.c.bf16 %v258_v9, %v258_v9  ;;  %s749_s19 = sld [smem:[#allocation2 + $0x2]]  ;;  %s750_s27 = sld [smem:[#allocation2 + $0x3]]  ;;  %vm659_vm15 = vcmask 7168  }
  0x24   : > { %v275_v14 = vmul.f32 %v259_v12, %v259_v12  ;;  %387 = vmatpush1.bf16.msra.mxu0 %v809_v7  ;;  %480 = vmatpush1.bf16.msra.mxu1 %v810_v8  ;;  %v816_v16 = vld [vmem:[%s1056_s2 + $0x60] ss:$8 sps:$4 sm:$0xff]   ;;  %v425_v24 = vpack.c.bf16 %v259_v12, %v259_v12  ;;  %s751_s29 = sld [smem:[#allocation2 + $0x4]]  ;;  %s752_s30 = sld [smem:[#allocation2 + $0x5]] }
  0x25   : > { %v264_v17 = vsel %vm263_vm0, %v262_v11, 0.0  ;;  %388 = vmatprep.subr.bf16.mxu0 %v811_v10  ;;  %481 = vmatprep.subr.bf16.mxu1 %v813_v13 }
  0x26   : > { %265 = vadd.xlane.f32.xlu0 %v264_v17  ;;  %v276_v20 = vsel %vm263_vm0, %v275_v14, 0.0  ;;  %v1025_v33 = vstv %s1022_s17  ;;  %s329_s20 = smul.f32 1e-15, %s1022_s17 }
  0x27   : > { %s632_s28 = smul.f32 2.0, %s1022_s17 }
  0x28   : > { %389 = vmatpush1.bf16.msra.mxu0 %v815_v15  ;;  %482 = vmatpush1.bf16.msra.mxu1 %v816_v16  ;;  %s558_s22 = smul.f32 2.0, %s252_s21 }
  0x29   : > { %390 = vmatprep.subr.bf16.mxu0 %v817_v18  ;;  %483 = vmatprep.subr.bf16.mxu1 %v819_v19 }
  0x2a   : > { %277 = vadd.xlane.f32.xlu0 %v276_v20 }
  0x2c   : > { %391 = vmatpush1.bf16.msra.mxu0 %v821_v21  ;;  %484 = vmatpush1.bf16.msra.mxu1 %v822_v22 }
  0x2f   : > { %763 = vmatmul.mubr.msk.bf16.vlgmr.msra.gmra.mrb[0].mxu0 %vm263_vm0, %v332_v23  ;;  %772 = vmatmul.mubr.msk.bf16.vlgmr.msra.gmra.mrb[0].mxu1 %vm263_vm0, %v425_v24 }
  0xb3   : > { %v266_v25 = vpop.xlane.xlu0 %265 }
  0xb4   : > { %823 = vrsqrt.f32 %v266_v25  ;;  %vm269_vm1 = vcmp.eq.f32.partialorder %v266_v25, inf  ;;  %v272_v29 = vand.u32 2147483648, %v266_v25  ;;  %vm271_vm2 = vcmp.eq.f32.partialorder %v266_v25, 0.0 }
  0xb7   : > { %v278_v26 = vpop.xlane.xlu0 %277 }
  0xb8   : > { %825 = vrsqrt.f32 %v278_v26  ;;  %vm281_vm3 = vcmp.eq.f32.partialorder %v278_v26, inf  ;;  %v284_v36 = vand.u32 2147483648, %v278_v26  ;;  %vm283_vm4 = vcmp.eq.f32.partialorder %v278_v26, 0.0 }
  0xbe   : > { %v824_v27 = vpop.eup %823 }
  0xbf   : > { %v268_v28 = vmul.f32 %v824_v27, %v266_v25 }
  0xc1   : > { %v270_v30 = vsel %vm269_vm1, %v266_v25, %v268_v28  ;;  %v1030_v28 = vstv %s329_s20 }
  0xc2   : > { %v826_v31 = vpop.eup %825  ;;  %v273_v32 = vsel %vm271_vm2, %v272_v29, %v270_v30 }
  0xc3   : > { %v274_v34 = vmax.f32 %v273_v32, 1e-15  ;;  %v280_v35 = vmul.f32 %v826_v31, %v278_v26 }
  0xc5   : > { %v282_v37 = vsel %vm281_vm3, %v278_v26, %v280_v35  ;;  %v288_v38 = vmul.f32 %v1025_v33, %v274_v34 }
  0xc6   : > { %v285_v39 = vsel %vm283_vm4, %v284_v36, %v282_v37 }
  0xc7   : > { %v286_v40 = vmax.f32 %v285_v39, 1e-15  ;;  %v753_v41 = vclamps-f32 %v288_v38, 0.9999999 }
  0xc9   : > { %v298_v42 = vmul.f32 %v1025_v33, %v286_v40  ;;  %v292_v43 = vsub.f32 1.0, %v753_v41  ;;  %v291_v46 = vadd.f32 1.0, %v753_v41 }
  0xcb   : > { %v754_v44 = vclamps-f32 %v298_v42, 0.9999999  ;;  %827 = vrcp.f32 %v292_v43 }
  0xcd   : > { %v302_v45 = vsub.f32 1.0, %v754_v44  ;;  %v301_v49 = vadd.f32 1.0, %v754_v44 }
  0xcf   : > { %829 = vrcp.f32 %v302_v45 }
  0xd5   : > { %v828_v47 = vpop.eup %827 }
  0xd6   : > { %v294_v48 = vmul.f32 %v828_v47, %v291_v46 }
  0xd8   : > { %831 = vlog2.f32 %v294_v48 }
  0xd9   : > { %v830_v50 = vpop.eup %829 }
  0xda   : > { %v304_v51 = vmul.f32 %v830_v50, %v301_v49 }
  0xdc   : > { %833 = vlog2.f32 %v304_v51 }
  0xe2   : > { %v832_v52 = vpop.eup %831 }
  0xe3   : > { %v296_v53 = vmul.f32 0.6931472, %v832_v52 }
  0xe5   : > { %v297_v56 = vmul.f32 0.5, %v296_v53 }
  0xe6   : > { %v834_v54 = vpop.eup %833 }
  0xe7   : > { %v306_v55 = vmul.f32 0.6931472, %v834_v54  ;;  %v308_v58 = vmul.f32 %v297_v56, %v297_v56  ;;  %v562_v54 = vstv %s749_s19 }
  0xe9   : > { %v307_v57 = vmul.f32 0.5, %v306_v55 }
  0xeb   : > { %v309_v59 = vmul.f32 %v307_v57, %v307_v57 }
  0xed   : > { %v310_v60 = vadd.f32 %v309_v59, %v308_v58 }
  0xef   : > { %835 = vrsqrt.f32 %v310_v60  ;;  %vm313_vm5 = vcmp.eq.f32.partialorder %v310_v60, inf  ;;  %v316_v63 = vand.u32 2147483648, %v310_v60  ;;  %vm315_vm6 = vcmp.eq.f32.partialorder %v310_v60, 0.0 }
  0xf0   : > { %837 = vrcp.f32 %v288_v38 }
  0xf9   : > { %v836_v61 = vpop.eup %835 }
  0xfa   : > { %v312_v62 = vmul.f32 %v836_v61, %v310_v60  ;;  %v838_v11 = vpop.eup %837 }
  0xfb   : > { %v324_v17 = vmul.f32 %v838_v11, %v297_v56 }
  0xfc   : > { %v314_v0 = vsel %vm313_vm5, %v310_v60, %v312_v62 }
  0xfd   : > { %v317_v1 = vsel %vm315_vm6, %v316_v63, %v314_v0 }
  0xfe   : > { %v318_v2 = vmax.f32 %v317_v1, 1e-15 }
 0x100   : > { %839 = vtanh.f32 %v318_v2 }
 0x101   : > { %841 = vrcp.f32 %v298_v42 }
 0x102   : > { %843 = vrcp.f32 %v318_v2  ;;  %v418_v3 = vpop.f32.mrb[0].mxu0  ;;  %v511_v4 = vpop.f32.mrb[0].mxu1  ;;  %v774_v2 = vld [vmem:[%s1057_s3] ss:$0 sm:$0xff] }
 0x103   : > { %v420_v5 = vpop.f32.mrb[1].mxu0  ;;  %v513_v6 = vpop.f32.mrb[1].mxu1 }
 0x104   : > { %v422_v7 = vpop.f32.mrb[2].mxu0  ;;  %v515_v8 = vpop.f32.mrb[2].mxu1 }
 0x105   : > { %v423_v9 = vpop.f32.mrb[3].mxu0  ;;  %v516_v10 = vpop.f32.mrb[3].mxu1 }
 0x106   : > { %v776_v9 = vld [vmem:[%s1057_s3 + $0x1] ss:$0 sm:$0xff] }
 0x10a   : > { %v840_v12 = vpop.eup %839 }
 0x10b   : > { %v842_v13 = vpop.eup %841  ;;  %v320_v14 = vmin.f32 %v840_v12, 0.99999 }
 0x10c   : > { %v844_v15 = vpop.eup %843  ;;  %v327_v18 = vmul.f32 %v842_v13, %v307_v57  ;;  %v559_v57 = vstv %s558_s22 }
 0x10d   : > { %v322_v16 = vmul.f32 %v844_v15, %v320_v14  ;;  %v331_v29 = vmax.f32 %v320_v14, %v1030_v28 }
 0x10f   : > { %v325_v19 = vmul.f32 %v324_v17, %v322_v16  ;;  %v328_v20 = vmul.f32 %v327_v18, %v322_v16  ;;  %v773_v30 = vclamps-f32 %v331_v29, 0.9999999 }
 0x111   : > { %v518_v21 = vmul.f32 %v418_v3, %v325_v19  ;;  %v520_v22 = vmul.f32 %v511_v4, %v328_v20  ;;  %v519_v23 = vmul.f32 %v420_v5, %v325_v19  ;;  %v521_v24 = vmul.f32 %v513_v6, %v328_v20 }
 0x112   : > { %v541_v31 = vsub.f32 1.0, %v773_v30  ;;  %v540_v34 = vadd.f32 1.0, %v773_v30 }
 0x113   : > { %v522_v25 = vadd.f32 %v520_v22, %v518_v21  ;;  %v523_v26 = vadd.f32 %v521_v24, %v519_v23 }
 0x114   : > { %845 = vrcp.f32 %v541_v31 }
 0x115   : > { %v526_v27 = vmul.f32 %v522_v25, %v522_v25 }
 0x117   : > { %527 = vadd.xlane.f32.xlu1 %v526_v27 }
 0x11b   : > { %524 = vadd.xlane.f32.xlu1 %v523_v26 }
 0x11e   : > { %v846_v32 = vpop.eup %845 }
 0x11f   : > { %v543_v35 = vmul.f32 %v846_v32, %v540_v34 }
 0x121   : > { %847 = vlog2.f32 %v543_v35 }
 0x12b   : > { %v848_v37 = vpop.eup %847 }
 0x12c   : > { %v545_v38 = vmul.f32 0.6931472, %v848_v37 }
 0x12e   : > { %v546_v43 = vmul.f32 0.5, %v545_v38 }
 0x1a4   : > { %v528_v36 = vpop.xlane.xlu1 %527 }
 0x1a5   : > { %849 = vrsqrt.f32 %v528_v36  ;;  %vm531_vm7 = vcmp.eq.f32.partialorder %v528_v36, inf  ;;  %v534_v41 = vand.u32 2147483648, %v528_v36  ;;  %vm533_vm8 = vcmp.eq.f32.partialorder %v528_v36, 0.0 }
 0x1a6   : > { %851 = vrcp.f32 %v331_v29 }
 0x1a8   : > { %v525_v58 = vpop.xlane.xlu1 %524 }
 0x1af   : > { %v850_v39 = vpop.eup %849 }
 0x1b0   : > { %v530_v40 = vmul.f32 %v850_v39, %v528_v36  ;;  %v852_v46 = vpop.eup %851 }
 0x1b1   : > { %v548_v48 = vmul.f32 %v852_v46, %v546_v43 }
 0x1b2   : > { %v532_v42 = vsel %vm531_vm7, %v528_v36, %v530_v40 }
 0x1b3   : > { %v535_v44 = vsel %vm533_vm8, %v534_v41, %v532_v42 }
 0x1b4   : > { %v536_v45 = vmax.f32 %v535_v44, 1e-15 }
 0x1b6   : > { %v537_v47 = vmul.f32 %v536_v45, %v1025_v33 }
 0x1b8   : > { %v549_v49 = vmul.f32 %v548_v48, %v537_v47 }
 0x1ba   : > { %853 = vtanh.f32 %v549_v49 }
 0x1bb   : > { %855 = vrcp.f32 %v537_v47 }
 0x1c4   : > { %v854_v50 = vpop.eup %853 }
 0x1c5   : > { %v552_v51 = vmin.f32 %v854_v50, 0.99999  ;;  %v856_v52 = vpop.eup %855 }
 0x1c7   : > { %v553_v53 = vsel %vm533_vm8, 0.0, %v552_v51 }
 0x1c8   : > { %v555_v55 = vmul.f32 %v856_v52, %v553_v53  ;;  %v557_v56 = vmul.f32 %v553_v53, %v553_v53 }
 0x1ca   : > { %v566_v59 = vmul.f32 %v562_v54, %v557_v56  ;;  %v556_v60 = vmul.f32 %v555_v55, %v525_v58  ;;  %v565_v63 = vsub.f32 1.0, %v557_v56  ;;  %v638_v58 = vstv %s751_s29 }
 0x1cc   : > { %v560_v61 = vmul.f32 %v559_v57, %v556_v60  ;;  %v576_v5 = vmul.f32 %v774_v2, %v565_v63  ;;  %v635_v57 = vstv %s750_s27 }
 0x1ce   : > { %v561_v62 = vadd.f32 1.0, %v560_v61 }
 0x1d0   : > { %v563_v0 = vadd.f32 %v562_v54, %v561_v62  ;;  %v567_v1 = vadd.f32 %v566_v59, %v561_v62  ;;  %v633_v54 = vstv %s632_s28 }
 0x1d2   : > { %v564_v3 = vmul.f32 %v563_v0, %v555_v55  ;;  %v568_v13 = vmax.f32 %v567_v1, 1e-15 }
 0x1d4   : > { %v571_v4 = vmul.f32 %v564_v3, %v522_v25 }
 0x1d6   : > { %v577_v6 = vadd.f32 %v576_v5, %v571_v4 }
 0x1d8   : > { %v578_v7 = vmul.f32 %v577_v6, %v577_v6  ;;  %v604_v8 = vmax.f32 %v577_v6, 0.0 }
 0x1da   : > { %579 = vadd.xlane.f32.xlu0 %v578_v7  ;;  %v605_v10 = vmul.f32 %v604_v8, %v604_v8  ;;  %v628_v11 = vmul.f32 %v776_v9, %v604_v8  ;;  %v657_v9 = vstv %s752_s30 }
 0x1dc   : > { %606 = vadd.xlane.f32.xlu1 %v605_v10 }
 0x1de   : > { %629 = vadd.xlane.f32.xlu0 %v628_v11 }
 0x267   : > { %v580_v12 = vpop.xlane.xlu0 %579 }
 0x268   : > { %857 = vrsqrt.f32 %v580_v12  ;;  %vm583_vm9 = vcmp.eq.f32.partialorder %v580_v12, inf  ;;  %v586_v16 = vand.u32 2147483648, %v580_v12  ;;  %vm585_vm10 = vcmp.eq.f32.partialorder %v580_v12, 0.0 }
 0x269   : > { %859 = vrcp.f32 %v568_v13  ;;  %v607_v26 = vpop.xlane.xlu1 %606 }
 0x26a   : > { %vm611_vm11 = vcmp.eq.f32.partialorder %v607_v26, inf  ;;  %v614_v41 = vand.u32 2147483648, %v607_v26  ;;  %vm613_vm12 = vcmp.eq.f32.partialorder %v607_v26, 0.0 }
 0x26b   : > { %v630_v53 = vpop.xlane.xlu0 %629 }
 0x272   : > { %v858_v14 = vpop.eup %857 }
 0x273   : > { %v582_v15 = vmul.f32 %v858_v14, %v580_v12  ;;  %v860_v20 = vpop.eup %859 }
 0x275   : > { %v584_v17 = vsel %vm583_vm9, %v580_v12, %v582_v15 }
 0x276   : > { %v587_v18 = vsel %vm585_vm10, %v586_v16, %v584_v17 }
 0x277   : > { %v588_v19 = vmul.f32 %v587_v18, %v1025_v33 }
 0x279   : > { %v589_v21 = vmul.f32 %v860_v20, %v588_v19 }
 0x27b   : > { %v590_v22 = vmax.f32 %v589_v21, %v1030_v28 }
 0x27d   : > { %v591_v23 = vmin.f32 %v590_v22, 0.99999 }
 0x27f   : > { %v775_v24 = vclamps-f32 %v591_v23, 0.9999999 }
 0x281   : > { %v595_v25 = vsub.f32 1.0, %v775_v24  ;;  %v594_v27 = vadd.f32 1.0, %v775_v24 }
 0x283   : > { %861 = vrcp.f32 %v595_v25 }
 0x284   : > { %863 = vrsqrt.f32 %v607_v26 }
 0x28d   : > { %v862_v29 = vpop.eup %861 }
 0x28e   : > { %v597_v30 = vmul.f32 %v862_v29, %v594_v27  ;;  %v864_v31 = vpop.eup %863 }
 0x28f   : > { %v610_v35 = vmul.f32 %v864_v31, %v607_v26 }
 0x290   : > { %865 = vlog2.f32 %v597_v30 }
 0x291   : > { %867 = vrcp.f32 %v590_v22  ;;  %v612_v39 = vsel %vm611_vm11, %v607_v26, %v610_v35 }
 0x292   : > { %v615_v43 = vsel %vm613_vm12, %v614_v41, %v612_v39 }
 0x29a   : > { %v866_v32 = vpop.eup %865 }
 0x29b   : > { %v599_v34 = vmul.f32 0.6931472, %v866_v32  ;;  %v868_v37 = vpop.eup %867 }
 0x29d   : > { %v600_v36 = vmul.f32 0.5, %v599_v34 }
 0x29f   : > { %v602_v38 = vmul.f32 %v868_v37, %v600_v36 }
 0x2a1   : > { %v603_v40 = vmul.f32 %v860_v20, %v602_v38 }
 0x2a3   : > { %v608_v42 = vmul.f32 %v603_v40, %v1025_v33 }
 0x2a5   : > { %v616_v44 = vmul.f32 %v615_v43, %v608_v42 }
 0x2a7   : > { %v617_v45 = vmax.f32 %v616_v44, %v1030_v28 }
 0x2a9   : > { %869 = vtanh.f32 %v617_v45 }
 0x2aa   : > { %871 = vrcp.f32 %v617_v45 }
 0x2b3   : > { %v870_v46 = vpop.eup %869 }
 0x2b4   : > { %v619_v47 = vmin.f32 %v870_v46, 0.99999  ;;  %v872_v48 = vpop.eup %871 }
 0x2b6   : > { %v621_v49 = vmul.f32 %v872_v48, %v619_v47  ;;  %v623_v50 = vmul.f32 %v619_v47, %v619_v47 }
 0x2b8   : > { %v622_v51 = vmul.f32 %v621_v49, %v603_v40  ;;  %v641_v52 = vsub.f32 1.0, %v623_v50  ;;  %v637_v28 = vadd.f32 1.0, %v623_v50 }
 0x2ba   : > { %v642_v55 = vmax.f32 %v641_v52, 1e-15  ;;  %v631_v33 = vmul.f32 %v630_v53, %v622_v51  ;;  %v639_v60 = vmul.f32 %v638_v58, %v637_v28 }
 0x2bc   : > { %873 = vrcp.f32 %v642_v55  ;;  %v634_v56 = vmul.f32 %v633_v54, %v631_v33 }
 0x2be   : > { %v636_v59 = vmul.f32 %v635_v57, %v634_v56 }
 0x2c0   : > { %v640_v61 = vsub.f32 %v636_v59, %v639_v60 }
 0x2c6   : > { %v874_v62 = vpop.eup %873 }
 0x2c7   : > { %v644_v63 = vmul.f32 %v874_v62, %v640_v61 }
 0x2c9   : > { %v645_v0 = vmul.f32 %v644_v63, %v644_v63 }
 0x2cb   : > { %v646_v1 = vadd.f32 1.0, %v645_v0 }
 0x2cd   : > { %875 = vrsqrt.f32 %v646_v1  ;;  %vm649_vm13 = vcmp.eq.f32.partialorder %v646_v1, inf  ;;  %v652_v4 = vand.u32 2147483648, %v646_v1  ;;  %vm651_vm14 = vcmp.eq.f32.partialorder %v646_v1, 0.0 }
 0x2d7   : > { %v876_v2 = vpop.eup %875 }
 0x2d8   : > { %v648_v3 = vmul.f32 %v876_v2, %v646_v1 }
 0x2da   : > { %v650_v5 = vsel %vm649_vm13, %v646_v1, %v648_v3 }
 0x2db   : > { %v653_v6 = vsel %vm651_vm14, %v652_v4, %v650_v5 }
 0x2dc   : > { %v654_v7 = vadd.f32 %v653_v6, %v644_v63 }
 0x2de   : > { %877 = vlog2.f32 %v654_v7 }
 0x2e8   : > { %v878_v8 = vpop.eup %877 }
 0x2e9   : > { %v656_v10 = vmul.f32 0.6931472, %v878_v8 }
 0x2eb   : > { %v658_v11 = vmul.f32 %v657_v9, %v656_v10 }
 0x2ed   : > { %660 = vst.msk [vmem:[%s250_s8] sm:$0xff] %vm659_vm15, %v658_v11 }
 0x2ee PF: > { %s16_s18 = sadd.s32 1, %s904_s18  }
 0x2ef   : > { %p13_p1 = scmp.ge.s32.totalorder %s16_s18, 6  }
 0x2f1   :  { %15 = sbr.rel (!%p13_p1) target bundleno = 1 (0x1), region = 78 }
 0x2f8   :  { %680 = vsyncpa [#allocation3], 1 }
 0x2f9   :  { %682 = vsyncpa [#allocation3 + $0x1], 1 }

</bundles_post_ra>
